<compile_context>
chip_gen: v7x
topology: tpu7x:2x2x1
jax: 0.10.0
libtpu: 0.0.40
codegen_flags: <defaults>
</compile_context>

<pallas_src>
import numpy as np
import jax
import jax.numpy as jnp
from jax.experimental import pallas as pl
from jax.experimental.pallas import tpu as pltpu


_MAX_ROW_TILE = 512                       # cap for M (row) tiles of the conv GEMMs
_CONV_COMPILER_PARAMS = pltpu.CompilerParams(
    dimension_semantics=("parallel",),    # shard M tiles across both TCs on v7x
    vmem_limit_bytes=48 * 1024 * 1024,    # explicit budget; leaves headroom on v7x (64 MiB)
)


# ----------------------------------------------------------------------------
# Pallas kernels
# ----------------------------------------------------------------------------
def _convT_pass1_kernel(x4_ref, w_ref, y_ref, stats_ref):
    """Sub-pixel convT GEMM tile + per-tile column sum / sum-of-squares (for BN).

    x4_ref    : (TM, 4*Cin)      bf16
    w_ref     : (4*Cin, 4*Cout)  bf16
    y_ref     : (TM, 4*Cout)     f32   pre-BN linear output tile
    stats_ref : (1, 2, 4*Cout)   f32   partial [sum, sum_sq] for this tile
    """
    y = jnp.dot(x4_ref[...], w_ref[...], preferred_element_type=jnp.float32)
    y_ref[...] = y
    # column reductions on the MXU (ones-vector matmul) instead of XLU axis-0 reduces
    ones = jnp.ones((1, y.shape[0]), jnp.float32)
    ssum = jnp.dot(ones, y, preferred_element_type=jnp.float32)        # (1, 4*Cout)
    ssq = jnp.dot(ones, y * y, preferred_element_type=jnp.float32)     # (1, 4*Cout)
    stats_ref[...] = jnp.concatenate([ssum, ssq], axis=0).reshape(1, 2, -1)


def _bn_relu_pass2_kernel(y_ref, scale_ref, shift_ref, o_ref):
    # y * (gamma*inv_std) + (beta - mean*gamma*inv_std), then ReLU
    o_ref[...] = jnp.maximum(y_ref[...] * scale_ref[...] + shift_ref[...], 0.0)


def _convT_tanh_kernel(x4_ref, w_ref, b_ref, o_ref):
    y = jnp.dot(x4_ref[...], w_ref[...], preferred_element_type=jnp.float32) + b_ref[...]
    o_ref[...] = jnp.tanh(y)


def _self_att_kernel(x_ref, wq_ref, bq_ref, wk_ref, bk_ref, wv_ref, bv_ref, g_ref,
                     out_ref, att_ref):
    # One batch element per grid step (N = H*W small at SAGAN feature-map sizes here).
    # TODO(synk): flash-style key-tiled online softmax for large feature maps (N >~ 1-2k).
    x = x_ref[0]                                                        # (N, C) f32
    xb = x.astype(jnp.bfloat16)
    q = jnp.dot(xb, wq_ref[...], preferred_element_type=jnp.float32) + bq_ref[...]
    k = jnp.dot(xb, wk_ref[...], preferred_element_type=jnp.float32) + bk_ref[...]
    v = jnp.dot(xb, wv_ref[...], preferred_element_type=jnp.float32) + bv_ref[...]
    s = jax.lax.dot_general(q.astype(jnp.bfloat16), k.astype(jnp.bfloat16),
                            (((1,), (1,)), ((), ())),
                            preferred_element_type=jnp.float32)         # (Nq, Nk)
    s = s - jnp.max(s, axis=-1, keepdims=True)
    e = jnp.exp(s)
    a = e * pl.reciprocal(jnp.sum(e, axis=-1, keepdims=True), approx=False)
    o = jnp.dot(a.astype(jnp.bfloat16), v.astype(jnp.bfloat16),
                preferred_element_type=jnp.float32)                     # (Nq, C)
    out_ref[0] = g_ref[0] * o + x
    att_ref[0] = a                     # 'b q k'; caller swaps to 'b k q' (module output)


# ----------------------------------------------------------------------------
# Glue helpers
# ----------------------------------------------------------------------------
def _to_nhwc(x):
    return jnp.transpose(x, (0, 2, 3, 1))


def _to_nchw(x):
    return jnp.transpose(x, (0, 3, 1, 2))


def _round_up(n, m):
    return (n + m - 1) // m * m


def _pick_row_tile(m, cap=_MAX_ROW_TILE):
    if m <= cap:
        return m
    t = cap
    while t >= 8:
        if m % t == 0:
            return t
        t -= 8
    return m


def _spectral_norm_convT(weight, u, eps=1e-12):
    # torch spectral_norm picks dim=1 for ConvTranspose2d: W_mat = (Cout, Cin*kh*kw)
    cout = weight.shape[1]
    w_mat = jnp.transpose(weight, (1, 0, 2, 3)).reshape(cout, -1)
    v = w_mat.T @ u
    v = v / jnp.maximum(jnp.linalg.norm(v), eps)
    u2 = w_mat @ v
    u2 = u2 / jnp.maximum(jnp.linalg.norm(u2), eps)
    sigma = jnp.vdot(u2, w_mat @ v)
    return weight / sigma


# Sub-pixel decomposition of ConvTranspose2d(k=3, s=2, p=1, output_padding=1):
#   y[2m,   2n  ] = x[m,n]W[1,1]
#   y[2m,   2n+1] = x[m,n]W[1,2] + x[m,n+1]W[1,0]
#   y[2m+1, 2n  ] = x[m,n]W[2,1] + x[m+1,n]W[0,1]
#   y[2m+1, 2n+1] = x[m,n]W[2,2] + x[m,n+1]W[2,0] + x[m+1,n]W[0,2] + x[m+1,n+1]W[0,0]
# (shift s in {00,01,10,11}, output parity plane p = 2*dr + dc)
_SUBPIXEL_TAPS = (
    ((0, 0), (1, 1)),                                   # (even, even)
    ((0, 1), (1, 2)), ((1, 1), (1, 0)),                 # (even, odd)
    ((0, 2), (2, 1)), ((2, 2), (0, 1)),                 # (odd, even)
    ((0, 3), (2, 2)), ((1, 3), (2, 0)),                 # (odd, odd)
    ((2, 3), (0, 2)), ((3, 3), (0, 0)),
)


def _subpixel_inputs(x_nhwc):
    """4 shifted copies of x, channel-concatenated: (B*H*W, 4*Cin) bf16, rows (b, m, n)."""
    B, H, W, C = x_nhwc.shape
    xb = x_nhwc.astype(jnp.bfloat16)
    xp = jnp.pad(xb, ((0, 0), (0, 1), (0, 1), (0, 0)))
    x4 = jnp.concatenate(
        [xp[:, dh:dh + H, dw:dw + W, :] for dh in (0, 1) for dw in (0, 1)], axis=-1)
    return x4.reshape(B * H * W, 4 * C), (B, H, W)


def _subpixel_wmat(w, cout_pad):
    """(Cin, Cout, 3, 3) ConvTranspose2d weight -> (4*Cin, 4*cout_pad) bf16 GEMM weight."""
    cin, cout = w.shape[0], w.shape[1]
    wp = jnp.pad(w, ((0, 0), (0, cout_pad - cout), (0, 0), (0, 0)))
    blk = jnp.zeros((4, 4, cin, cout_pad), w.dtype)        # (shift, plane, Cin, Cout_pad)
    for (s, p), (kh, kw) in _SUBPIXEL_TAPS:
        blk = blk.at[s, p].set(wp[:, :, kh, kw])
    return blk.transpose(0, 2, 1, 3).reshape(4 * cin, 4 * cout_pad).astype(jnp.bfloat16)


def _depth_to_space(y4, B, H, W, cout_pad, cout):
    """(B*H*W, 4*cout_pad) plane-major columns -> (B, 2H, 2W, cout) NHWC."""
    y = y4.reshape(B, H, W, 2, 2, cout_pad)
    y = y.transpose(0, 1, 3, 2, 4, 5).reshape(B, 2 * H, 2 * W, cout_pad)
    return y if cout_pad == cout else y[..., :cout]


def _convT_gemm_pass1(x4, wmat):
    M, K4 = x4.shape
    N4 = wmat.shape[1]
    TM = _pick_row_tile(M)
    nt = M // TM
    y4, stats = pl.pallas_call(
        _convT_pass1_kernel,
        grid=(nt,),
        in_specs=[pl.BlockSpec((TM, K4), lambda m: (m, 0)),
                  pl.BlockSpec((K4, N4), lambda m: (0, 0))],
        out_specs=(pl.BlockSpec((TM, N4), lambda m: (m, 0)),
                   pl.BlockSpec((1, 2, N4), lambda m: (m, 0, 0))),
        out_shape=(jax.ShapeDtypeStruct((M, N4), jnp.float32),
                   jax.ShapeDtypeStruct((nt, 2, N4), jnp.float32)),
        compiler_params=_CONV_COMPILER_PARAMS,
    )(x4, wmat)
    return y4, stats, TM, nt


# ----------------------------------------------------------------------------
# Layer wrappers (NHWC in, NHWC out)
# ----------------------------------------------------------------------------
def convT_bn_relu(x_nhwc, p, *, eps=1e-5):
    """spectral_norm(ConvTranspose2d(3,2,1,1)) -> BatchNorm2d (batch stats) -> ReLU.

    The conv bias is exactly cancelled by BN's mean subtraction, so it is never
    loaded or added (exact simplification, not an approximation)."""
    w = _spectral_norm_convT(p['w'], p['u'])
    cout = w.shape[1]
    cout_p = _round_up(cout, 32)                  # 4*cout_p is a multiple of 128 (lane dense)
    x4, (B, H, W) = _subpixel_inputs(x_nhwc)
    wmat = _subpixel_wmat(w, cout_p)
    y4, stats, TM, nt = _convT_gemm_pass1(x4, wmat)
    M, N4 = y4.shape

    # finalize BN batch statistics (tiny per-channel reduction in plain JAX)
    s = stats.sum(axis=0)                                       # (2, 4*cout_p)
    s1 = s[0].reshape(4, cout_p).sum(axis=0)[:cout]
    s2 = s[1].reshape(4, cout_p).sum(axis=0)[:cout]
    cnt = 4.0 * M                                               # = B * (2H) * (2W)
    mean = s1 / cnt
    var = s2 / cnt - mean * mean                                # biased, as torch training BN
    scale_c = p['bn_g'] * jax.lax.rsqrt(var + eps)
    shift_c = p['bn_b'] - mean * scale_c
    scale4 = jnp.tile(jnp.pad(scale_c, (0, cout_p - cout)), 4)[None, :]
    shift4 = jnp.tile(jnp.pad(shift_c, (0, cout_p - cout)), 4)[None, :]

    out4 = pl.pallas_call(
        _bn_relu_pass2_kernel,
        grid=(nt,),
        in_specs=[pl.BlockSpec((TM, N4), lambda m: (m, 0)),
                  pl.BlockSpec((1, N4), lambda m: (0, 0)),
                  pl.BlockSpec((1, N4), lambda m: (0, 0))],
        out_specs=pl.BlockSpec((TM, N4), lambda m: (m, 0)),
        out_shape=jax.ShapeDtypeStruct((M, N4), jnp.float32),
        compiler_params=_CONV_COMPILER_PARAMS,
    )(y4, scale4, shift4)
    return _depth_to_space(out4, B, H, W, cout_p, cout)


def convT_tanh(x_nhwc, p):
    """ConvTranspose2d(3,2,1,1) + bias -> Tanh, lane-dense padded output channels."""
    w, b = p['w'], p['b']
    cout = w.shape[1]
    cout_p = _round_up(cout, 32)
    x4, (B, H, W) = _subpixel_inputs(x_nhwc)
    wmat = _subpixel_wmat(w, cout_p)
    b4 = jnp.tile(jnp.pad(b, (0, cout_p - cout)), 4)[None, :].astype(jnp.float32)
    M, K4 = x4.shape
    N4 = 4 * cout_p
    TM = _pick_row_tile(M)
    nt = M // TM
    out4 = pl.pallas_call(
        _convT_tanh_kernel,
        grid=(nt,),
        in_specs=[pl.BlockSpec((TM, K4), lambda m: (m, 0)),
                  pl.BlockSpec((K4, N4), lambda m: (0, 0)),
                  pl.BlockSpec((1, N4), lambda m: (0, 0))],
        out_specs=pl.BlockSpec((TM, N4), lambda m: (m, 0)),
        out_shape=jax.ShapeDtypeStruct((M, N4), jnp.float32),
        compiler_params=_CONV_COMPILER_PARAMS,
    )(x4, wmat, b4)
    return _depth_to_space(out4, B, H, W, cout_p, cout)


def self_att_forward(x_nhwc, p):
    B, H, W, C = x_nhwc.shape
    N = H * W
    Cq = p['wq'].shape[1]
    x_flat = x_nhwc.reshape(B, N, C)                  # already position-major: no transpose
    out_flat, att_qk = pl.pallas_call(
        _self_att_kernel,
        grid=(B,),
        in_specs=[
            pl.BlockSpec((1, N, C), lambda b: (b, 0, 0)),
            pl.BlockSpec((C, Cq), lambda b: (0, 0)),
            pl.BlockSpec((1, Cq), lambda b: (0, 0)),
            pl.BlockSpec((C, Cq), lambda b: (0, 0)),
            pl.BlockSpec((1, Cq), lambda b: (0, 0)),
            pl.BlockSpec((C, C), lambda b: (0, 0)),
            pl.BlockSpec((1, C), lambda b: (0, 0)),
            pl.BlockSpec(memory_space=pltpu.MemorySpace.SMEM),       # gamma scalar
        ],
        out_specs=(pl.BlockSpec((1, N, C), lambda b: (b, 0, 0)),
                   pl.BlockSpec((1, N, N), lambda b: (b, 0, 0))),
        out_shape=(jax.ShapeDtypeStruct((B, N, C), jnp.float32),
                   jax.ShapeDtypeStruct((B, N, N), jnp.float32)),
        compiler_params=pltpu.CompilerParams(dimension_semantics=("parallel",)),
    )(x_flat, p['wq'].astype(jnp.bfloat16), p['bq'],
      p['wk'].astype(jnp.bfloat16), p['bk'],
      p['wv'].astype(jnp.bfloat16), p['bv'], p['gamma'])
    out = out_flat.reshape(B, H, W, C)
    att = jnp.swapaxes(att_qk, 1, 2)                  # 'b q k' -> 'b k q' as the module returns
    return out, att


# ----------------------------------------------------------------------------
# Parameter construction (deterministic, synthetic values; shapes from __init__)
# ----------------------------------------------------------------------------
def _block_params(key, cin, cout):
    ks = jax.random.split(key, 5)
    u = jax.random.normal(ks[2], (cout,), jnp.float32)
    u = u / jnp.maximum(jnp.linalg.norm(u), 1e-12)
    return dict(
        w=0.02 * jax.random.normal(ks[0], (cin, cout, 3, 3), jnp.float32),
        b=0.01 * jax.random.normal(ks[1], (cout,), jnp.float32),   # unused: cancelled by BN
        u=u,                                            # spectral-norm power-iteration vector
        bn_g=1.0 + 0.05 * jax.random.normal(ks[3], (cout,), jnp.float32),
        bn_b=0.05 * jax.random.normal(ks[4], (cout,), jnp.float32),
    )


def _final_params(key, cin, cout):
    ks = jax.random.split(key, 2)
    return dict(
        w=0.02 * jax.random.normal(ks[0], (cin, cout, 3, 3), jnp.float32),
        b=0.01 * jax.random.normal(ks[1], (cout,), jnp.float32),
    )


def _att_params(key, c):
    cq = c // 8
    ks = jax.random.split(key, 6)
    return dict(
        wq=0.1 * jax.random.normal(ks[0], (c, cq), jnp.float32),
        bq=0.01 * jax.random.normal(ks[1], (1, cq), jnp.float32),
        wk=0.1 * jax.random.normal(ks[2], (c, cq), jnp.float32),
        bk=0.01 * jax.random.normal(ks[3], (1, cq), jnp.float32),
        wv=0.1 * jax.random.normal(ks[4], (c, c), jnp.float32),
        bv=0.01 * jax.random.normal(ks[5], (1, c), jnp.float32),
        # module __init__ uses zeros; nonzero used here so the residual-mix path is exercised
        gamma=jnp.full((1,), 0.1, jnp.float32),
    )


def init_generator_params(key, img_shape, z_dim=128, conv_dim=32):
    assert 2 ** int(np.log2(img_shape[-1])) == img_shape[-1]
    repeat_num = int(np.log2(img_shape[-1])) - 2
    dim = conv_dim * 2 ** repeat_num
    keys = iter(jax.random.split(key, 64))

    block1 = [_block_params(next(keys), z_dim, dim)]
    d = dim
    for _ in range(repeat_num - 2):
        block1.append(_block_params(next(keys), d, d // 2))
        d //= 2
    attn1 = _att_params(next(keys), d)
    block2 = [_block_params(next(keys), d, d // 2)]
    d //= 2
    attn2 = _att_params(next(keys), d)
    block3 = _final_params(next(keys), d, img_shape[0])
    return dict(block1=block1, attn1=attn1, block2=block2, attn2=attn2, block3=block3)


# ----------------------------------------------------------------------------
# Generator forward (NCHW in, NCHW out — conversions only at the model boundary)
# ----------------------------------------------------------------------------
def generator_forward(params, z_nchw):
    img = _to_nhwc(z_nchw)
    for blk in params['block1']:
        img = convT_bn_relu(img, blk)
    img, p1 = self_att_forward(img, params['attn1'])
    for blk in params['block2']:
        img = convT_bn_relu(img, blk)
    img, p2 = self_att_forward(img, params['attn2'])
    img = convT_tanh(img, params['block3'])
    return _to_nchw(img), p1, p2


# ----------------------------------------------------------------------------
# Plain-JAX reference for the ConvTranspose2d math (used only for self-checks)
# ----------------------------------------------------------------------------
def _convT_direct_ref(x_nchw, w, b):
    """PyTorch ConvTranspose2d(k=3, s=2, p=1, output_padding=1): direct scatter formula."""
    B, Cin, H, W = x_nchw.shape
    Cout = w.shape[1]
    t = jnp.einsum('bchw,cokl->bohwkl', x_nchw, w)
    canvas = jnp.zeros((B, Cout, 2 * H + 1, 2 * W + 1), jnp.float32)
    for kh in range(3):
        for kw in range(3):
            canvas = canvas.at[:, :, kh:kh + 2 * H - 1:2, kw:kw + 2 * W - 1:2].add(t[..., kh, kw])
    return canvas[:, :, 1:1 + 2 * H, 1:1 + 2 * W] + b[None, :, None, None]


if __name__ == "__main__":
    key = jax.random.PRNGKey(0)
    img_shape = (3, 16, 16)     # repeat_num=2 -> block1 has one upsample block
    z_dim, conv_dim, batch = 128, 32, 2

    # --- self-check 1: conv-transpose GEMM path (multi-tile grid) vs direct formula ---
    kc = jax.random.split(jax.random.PRNGKey(1), 4)
    x_chk = jax.random.normal(kc[0], (2, 8, 32, 32), jnp.float32)       # NCHW, M=2048 -> 4 tiles
    p_chk = _final_params(kc[1], 8, 16)
    got = _to_nchw(convT_tanh(_to_nhwc(x_chk), p_chk))
    want = jnp.tanh(_convT_direct_ref(x_chk, p_chk['w'], p_chk['b']))
    assert np.allclose(np.asarray(got), np.asarray(want), atol=1e-2), "convT+tanh mismatch"

    # --- self-check 2: conv-transpose + two-pass BatchNorm + ReLU vs plain-JAX reference ---
    p_bn = _block_params(kc[2], 8, 16)
    x_bn = jax.random.normal(kc[3], (2, 8, 32, 32), jnp.float32)
    got_bn = _to_nchw(convT_bn_relu(_to_nhwc(x_bn), p_bn))
    w_sn = _spectral_norm_convT(p_bn['w'], p_bn['u'])
    y_ref = _convT_direct_ref(x_bn, w_sn, jnp.zeros((16,), jnp.float32))  # bias cancelled by BN
    mu = y_ref.mean(axis=(0, 2, 3), keepdims=True)
    vv = jnp.mean((y_ref - mu) ** 2, axis=(0, 2, 3), keepdims=True)
    want_bn = jnp.maximum(
        (y_ref - mu) * jax.lax.rsqrt(vv + 1e-5) * p_bn['bn_g'][None, :, None, None]
        + p_bn['bn_b'][None, :, None, None], 0.0)
    assert np.allclose(np.asarray(got_bn), np.asarray(want_bn), atol=5e-2), "convT+BN mismatch"

    # --- full generator forward ---
    params = init_generator_params(key, img_shape, z_dim=z_dim, conv_dim=conv_dim)
    z = jax.random.normal(jax.random.fold_in(key, 999), (batch, z_dim, 2, 2), jnp.float32)

    fwd = jax.jit(generator_forward)
    img, p1, p2 = fwd(params, z)
    jax.block_until_ready((img, p1, p2))

    assert img.shape == (batch, img_shape[0], img_shape[1], img_shape[2]), img.shape
    assert p1.shape == (batch, 16, 16), p1.shape          # attn1 on 4x4 feature map -> N=16
    assert p2.shape == (batch, 64, 64), p2.shape          # attn2 on 8x8 feature map -> N=64
    assert bool(jnp.all(jnp.isfinite(img))) and bool(jnp.all(jnp.abs(img) <= 1.0))
    # returned attention is 'b k q': softmax rows sum to 1 along the key axis
    assert np.allclose(np.asarray(jnp.sum(p1, axis=1)), 1.0, atol=1e-4)
    assert np.allclose(np.asarray(jnp.sum(p2, axis=1)), 1.0, atol=1e-4)
    print("KERNEL_OK")
</pallas_src>

<mosaic_0001>
module attributes {stable_mosaic.version = 11 : i64} {
  func.func @_convT_tanh_kernel(%arg0: i32, %arg1: memref<512x32xbf16, #tpu.memory_space<vmem>>, %arg2: memref<32x128xbf16, #tpu.memory_space<vmem>>, %arg3: memref<1x128xf32, #tpu.memory_space<vmem>>, %arg4: memref<512x128xf32, #tpu.memory_space<vmem>>) attributes {dimension_semantics = [#tpu.dimension_semantics<parallel>], iteration_bounds = array<i64: 4>, scalar_prefetch = 0 : i64, scratch_operands = 0 : i64, tpu.core_type = #tpu.core_type<tc>, window_params = [{transform_indices = @transform_0, window_bounds = array<i64: 512, 32>}, {pipeline_mode = #tpu.pipeline_mode<synchronous>, transform_indices = @transform_1, window_bounds = array<i64: 32, 128>}, {pipeline_mode = #tpu.pipeline_mode<synchronous>, transform_indices = @transform_2, window_bounds = array<i64: 1, 128>}, {transform_indices = @transform_3, window_bounds = array<i64: 512, 128>}]} {
    %c0 = arith.constant 0 : index
    %c0_0 = arith.constant 0 : index
    %0 = vector.load %arg1[%c0, %c0_0] : memref<512x32xbf16, #tpu.memory_space<vmem>>, vector<512x32xbf16>
    %c0_1 = arith.constant 0 : index
    %c0_2 = arith.constant 0 : index
    %1 = vector.load %arg2[%c0_1, %c0_2] : memref<32x128xbf16, #tpu.memory_space<vmem>>, vector<32x128xbf16>
    %cst = arith.constant dense<0.000000e+00> : vector<512x128xf32>
    %2 = tpu.matmul %0, %1, %cst {dimension_numbers = #tpu.dot_dimension_numbers<[1], [0], [0], [1], [0, 0, 1, 1], [], []>} : vector<512x32xbf16>, vector<32x128xbf16>, vector<512x128xf32> -> vector<512x128xf32>
    %c0_3 = arith.constant 0 : index
    %c0_4 = arith.constant 0 : index
    %3 = vector.load %arg3[%c0_3, %c0_4] : memref<1x128xf32, #tpu.memory_space<vmem>>, vector<1x128xf32>
    %4 = vector.broadcast %3 : vector<1x128xf32> to vector<512x128xf32>
    %5 = arith.addf %2, %4 : vector<512x128xf32>
    %6 = math.tanh %5 : vector<512x128xf32>
    %c0_5 = arith.constant 0 : index
    %c0_6 = arith.constant 0 : index
    %7 = vector.load %arg4[%c0_5, %c0_6] : memref<512x128xf32, #tpu.memory_space<vmem>>, vector<512x128xf32>
    tpu.vector_store %arg4[%c0_5, %c0_6], %6 {strides = array<i32>} : memref<512x128xf32, #tpu.memory_space<vmem>>, vector<512x128xf32>,
    return
  }
  func.func @transform_0(%arg0: i32) -> (i32, i32) {
    %c0_i32 = arith.constant 0 : i32
    %c0_i32_0 = arith.constant 0 : i32
    return %arg0, %c0_i32 : i32, i32
  }
  func.func @transform_1(%arg0: i32) -> (i32, i32) {
    %c0_i32 = arith.constant 0 : i32
    %c0_i32_0 = arith.constant 0 : i32
    %c0_i32_1 = arith.constant 0 : i32
    return %c0_i32, %c0_i32_0 : i32, i32
  }
  func.func @transform_2(%arg0: i32) -> (i32, i32) {
    %c0_i32 = arith.constant 0 : i32
    %c0_i32_0 = arith.constant 0 : i32
    %c0_i32_1 = arith.constant 0 : i32
    return %c0_i32, %c0_i32_0 : i32, i32
  }
  func.func @transform_3(%arg0: i32) -> (i32, i32) {
    %c0_i32 = arith.constant 0 : i32
    %c0_i32_0 = arith.constant 0 : i32
    return %arg0, %c0_i32 : i32, i32
  }
}

</mosaic_0001>

<bundles_post_ra>
// kernel: tpu_custom_call.1
= control target key start
LH: loop header
LB: loop body
LE: loop exit
PB: predicated region body
PF: predicated region fallthrough
CT: control target
= control target key end

     0   :  { %8 = vsyncpa [#allocation3], 0  ;;  %s1800_s0 = inlined_call_operand.vmem [shape: bf16[2048,32], index: 0, kind: input, shape index: {}]   ;;  %s1801_s1 = inlined_call_operand.vmem [shape: bf16[32,128], index: 1, kind: input, shape index: {}]   ;;  %s1802_s2 = inlined_call_operand.vmem [shape: f32[1,128], index: 2, kind: input, shape index: {}]   ;;  %s1803_s3 = inlined_call_operand.hbm [shape: f32[2048,128], index: 3, kind: output, shape index: {}]  }
   0x1   :  { %10 = vsyncpa [#allocation3 + $0x1], 0  ;;  %s1486_s12 = smov 0   ;;  %s1488_s13 = smov 0  }
   0x2   :  { %s1490_s14 = smov 0   ;;  %s1492_s15 = smov 0  }
   0x3 LB: > { %s1507_s16 = sadd.s32 4294967295, %s1461_s15   ;;  %s1010_s17 = sadd.s32 4294967294, %s1461_s15   ;;  %s1461_s15 = sphi %s1492_s15, %s1809_s15   ;;  %s1457_s14 = sphi %s1490_s14, %s1808_s14   ;;  %s1453_s13 = sphi %s1488_s13, %s1807_s13   ;;  %s1449_s12 = sphi %s1486_s12, %s1806_s12  }
   0x4   : > { %s1511_s18 = sadd.s32 1, %s1461_s15   ;;  %s91_s19 = sadd.s32 1, %s1457_s14 }
   0x5   : > { %s88_s20 = ssub.s32 %s1461_s15, %s1511_s18  ;;  %p101_p0 = scmp.ne.s32.totalorder %s1457_s14, %s1453_s13 }
   0x6   : > { %p89_p1 = scmp.eq.s32.totalorder %s88_s20, 0  ;;  %p102_p2 = scmp.eq.s32.totalorder %s1507_s16, 3 }
   0x7   : > { %p107_p3 = scmp.ne.s32.totalorder %s1453_s13, %s1449_s12  ;;  %p108_p4 = scmp.eq.s32.totalorder %s1010_s17, 3 }
   0x8   : > { %s1522_s21 = scalar_select %p89_p1, %s1457_s14, %s91_s19  }
   0x9   : > { %p1524_p5 = por %p102_p2, %p101_p0  ;;  %p1528_p6 = por %p108_p4, %p107_p3 }
   0xa   : > { %p1013_p7 = scmp.ge.s32.totalorder %s1461_s15, 1  ;;  %p141_p8 = scmp.lt.s32.totalorder %s1461_s15, 5 }
   0xc   : > { %p142_p9 = pnand %p1013_p7, %p141_p8 }
   0xd   : > { %v1237_v0 = vld [vmem:[%s1801_s1] sm:$0xff] (!%p142_p9)   ;;  %s1015_s26 = sshll.u32 (!%p142_p9), %s1507_s16, 6  ;;  %v1238_v1 = vld [vmem:[%s1801_s1 + $0x8] sm:$0xff] (!%p142_p9)   ;;  %vm420_vm0 = vcmask (!%p142_p9), 261120   ;;  %s162_s8 = sand.u32 (!%p142_p9), 1, %s1453_s13  }
   0xe   : > { %145 = sbr.rel (%p142_p9) target bundleno = 331 (0x14b), region = 32  ;;  %p166_p10 = scmp.lt.s32.totalorder (!%p142_p9), %s1015_s26, 255  ;;  %1124 = vmatprep.subr.bf16.mxu0 (!%p142_p9), %v1237_v0  ;;  %1192 = vmatprep.subr.bf16.mxu1 (!%p142_p9), %v1237_v0  ;;  %v1613_v34 = vld [vmem:[%s1802_s2] ss:$0 sm:$0xff] (!%p142_p9) }
   0xf   : > { %1125 = vmatpush3.bf16.msra.mxu0 (!%p142_p9), %v1237_v0  ;;  %1194 = vmatpush3.bf16.msra.mxu1 (!%p142_p9), %v1237_v0  ;;  %s1014_s9 = sshll.u32 (!%p142_p9), %s162_s8, 9  ;;  %s1089_s11 = sshll.u32 (!%p142_p9), %s1507_s16, 13 }
  0x10   : > { %1126 = vmatprep.subr.bf16.mxu0 (!%p142_p9), %v1238_v1  ;;  %1193 = vmatprep.subr.bf16.mxu1 (!%p142_p9), %v1238_v1  ;;  %s1633_s10 = scalar_lea.vmem (!%p142_p9), [#allocation2], %s1014_s9  ;;  %s1750_s24 = scalar_lea.hbm (!%p142_p9), %s1803_s3, %s1089_s11 }
  0x11   : > { %s948_s17 = sshll.u32 (!%p142_p9), %s1633_s10, 4  ;;  %s1759_s16 = scalar_lea.sflag (!%p142_p9), [#allocation3], %s162_s8  ;;  %s1752_s17 = int_to_ptr.vmem [resolvable:$true] %s948_s17 }
  0x12   : > { %s1399_s25 = scalar_lea.vmem (!%p142_p9), %s1752_s17, 8192 }
  0x13   : > { %1127 = vmatpush3.bf16.msra.mxu0 (!%p142_p9), %v1238_v1  ;;  %1195 = vmatpush3.bf16.msra.mxu1 (!%p142_p9), %v1238_v1  ;;  %p1400_p11 = scmp.ne.s32.totalorder (!%p142_p9), %s1752_s17, %s1399_s25 }
  0x15   : > { %s1811_s26 = smov (!%p166_p10, %s1015_s26), 255  ;;  %p1401_p12 = pnand %p1400_p11, %p1524_p5 }
  0x16   : > { %s1016_s29 = sshll.u32 %s1811_s26, 2  ;;  %s1463_s26 = smov [#allocation2]  }
  0x17   : > { %s1544_s5 = scalar_lea.vmem %s1800_s0, %s1016_s29  ;;  %p1402_p13 = pneg %p1401_p12 }
  0x18   : > { %v1239_v2 = vld [vmem:[%s1544_s5] sm:$0xff]   ;;  %v1241_v4 = vld [vmem:[%s1544_s5 + $0x8] sm:$0xff]   ;;  %v1243_v6 = vld [vmem:[%s1544_s5 + $0x10] sm:$0xff]   ;;  %s1403_s27 = sshll.u32 %s1463_s26, 4  ;;  %s1404_s27 = int_to_ptr.vmem [resolvable:$false] %s1403_s27 }
  0x19   : > { %v1240_v3 = vld [vmem:[%s1544_s5 + $0x80] sm:$0xff]   ;;  %1128 = vmatprep.mubr.msk.bf16.mxu0 %vm420_vm0, %v1239_v2  ;;  %v1242_v5 = vld [vmem:[%s1544_s5 + $0x88] sm:$0xff]   ;;  %v1244_v7 = vld [vmem:[%s1544_s5 + $0x90] sm:$0xff]   ;;  %s1405_s28 = scalar_lea.vmem %s1404_s27, 16384  ;;  %p1406_p0 = scmp.lt.s32.totalorder %s1752_s17, %s1404_s27 }
  0x1a   : > { %1160 = vmatprep.mubr.msk.bf16.mxu1 %vm420_vm0, %v1240_v3  ;;  %1129 = vmatmul.mubr.msk.bf16.vlgmr.msra.gmra.mrb[0].mxu0 %vm420_vm0, %v1241_v4  ;;  %v1245_v8 = vld [vmem:[%s1544_s5 + $0x18] sm:$0xff]   ;;  %v1247_v10 = vld [vmem:[%s1544_s5 + $0x20] sm:$0xff]   ;;  %v1249_v12 = vld [vmem:[%s1544_s5 + $0x28] sm:$0xff]   ;;  %p1407_p1 = scmp.lt.s32.totalorder %s1405_s28, %s1399_s25 }
  0x1b   : > { %1161 = vmatmul.mubr.msk.bf16.vlgmr.msra.gmra.mrb[0].mxu1 %vm420_vm0, %v1242_v5  ;;  %1132 = vmatprep.mubr.msk.bf16.mxu0 %vm420_vm0, %v1243_v6  ;;  %v1246_v9 = vld [vmem:[%s1544_s5 + $0x98] sm:$0xff]   ;;  %v1248_v11 = vld [vmem:[%s1544_s5 + $0xa0] sm:$0xff]   ;;  %v1250_v13 = vld [vmem:[%s1544_s5 + $0xa8] sm:$0xff]  }
  0x1c   : > { %1164 = vmatprep.mubr.msk.bf16.mxu1 %vm420_vm0, %v1244_v7  ;;  %v1251_v14 = vld [vmem:[%s1544_s5 + $0x30] sm:$0xff]   ;;  %v1253_v16 = vld [vmem:[%s1544_s5 + $0x38] sm:$0xff]   ;;  %v1255_v18 = vld [vmem:[%s1544_s5 + $0x40] sm:$0xff]   ;;  %p1408_p2 = por %p1407_p1, %p1406_p0 }
  0x1d   : > { %v1252_v15 = vld [vmem:[%s1544_s5 + $0xb0] sm:$0xff]   ;;  %v1254_v17 = vld [vmem:[%s1544_s5 + $0xb8] sm:$0xff]   ;;  %v1256_v19 = vld [vmem:[%s1544_s5 + $0xc0] sm:$0xff]  }
  0x1e   : > { %v1257_v20 = vld [vmem:[%s1544_s5 + $0x48] sm:$0xff]   ;;  %v1259_v22 = vld [vmem:[%s1544_s5 + $0x50] sm:$0xff]   ;;  %v1261_v24 = vld [vmem:[%s1544_s5 + $0x58] sm:$0xff]   ;;  %p1409_p3 = pnand %p1408_p2, %p1402_p13 }
  0x1f   : > { %v1258_v21 = vld [vmem:[%s1544_s5 + $0xc8] sm:$0xff]   ;;  %v1260_v23 = vld [vmem:[%s1544_s5 + $0xd0] sm:$0xff]   ;;  %v1262_v25 = vld [vmem:[%s1544_s5 + $0xd8] sm:$0xff]  }
  0x20   : > { %v1263_v26 = vld [vmem:[%s1544_s5 + $0x60] sm:$0xff]   ;;  %v1265_v28 = vld [vmem:[%s1544_s5 + $0x68] sm:$0xff]   ;;  %v1267_v30 = vld [vmem:[%s1544_s5 + $0x70] sm:$0xff]  }
  0x21   : > { %v1264_v27 = vld [vmem:[%s1544_s5 + $0xe0] sm:$0xff]   ;;  %v1266_v29 = vld [vmem:[%s1544_s5 + $0xe8] sm:$0xff]   ;;  %v1268_v31 = vld [vmem:[%s1544_s5 + $0xf0] sm:$0xff]  }
  0x22   : > { %1133 = vmatmul.mubr.msk.bf16.gmra.mrb[4].mxu0 %vm420_vm0, %v1245_v8  ;;  %v1269_v32 = vld [vmem:[%s1544_s5 + $0x78] sm:$0xff]  }
  0x23   : > { %1165 = vmatmul.mubr.msk.bf16.gmra.mrb[4].mxu1 %vm420_vm0, %v1246_v9  ;;  %1136 = vmatprep.mubr.msk.bf16.mxu0 %vm420_vm0, %v1247_v10  ;;  %v1270_v33 = vld [vmem:[%s1544_s5 + $0xf8] sm:$0xff]  }
  0x24   : > { %1168 = vmatprep.mubr.msk.bf16.mxu1 %vm420_vm0, %v1248_v11 }
  0x2a   : > { %1137 = vmatmul.mubr.msk.bf16.gmra.mrb[8].mxu0 %vm420_vm0, %v1249_v12 }
  0x2b   : > { %1169 = vmatmul.mubr.msk.bf16.gmra.mrb[8].mxu1 %vm420_vm0, %v1250_v13  ;;  %1140 = vmatprep.mubr.msk.bf16.mxu0 %vm420_vm0, %v1251_v14 }
  0x2c   : > { %1172 = vmatprep.mubr.msk.bf16.mxu1 %vm420_vm0, %v1252_v15 }
  0x32   : > { %1141 = vmatmul.mubr.msk.bf16.gmra.mrb[12].mxu0 %vm420_vm0, %v1253_v16 }
  0x33   : > { %1173 = vmatmul.mubr.msk.bf16.gmra.mrb[12].mxu1 %vm420_vm0, %v1254_v17  ;;  %1144 = vmatprep.mubr.msk.bf16.mxu0 %vm420_vm0, %v1255_v18 }
  0x34   : > { %1176 = vmatprep.mubr.msk.bf16.mxu1 %vm420_vm0, %v1256_v19 }
  0x3a   : > { %1145 = vmatmul.mubr.msk.bf16.gmra.mrb[16].mxu0 %vm420_vm0, %v1257_v20 }
  0x3b   : > { %1177 = vmatmul.mubr.msk.bf16.gmra.mrb[16].mxu1 %vm420_vm0, %v1258_v21  ;;  %1148 = vmatprep.mubr.msk.bf16.mxu0 %vm420_vm0, %v1259_v22 }
  0x3c   : > { %1180 = vmatprep.mubr.msk.bf16.mxu1 %vm420_vm0, %v1260_v23 }
  0x42   : > { %1149 = vmatmul.mubr.msk.bf16.gmra.mrb[20].mxu0 %vm420_vm0, %v1261_v24 }
  0x43   : > { %1181 = vmatmul.mubr.msk.bf16.gmra.mrb[20].mxu1 %vm420_vm0, %v1262_v25  ;;  %1152 = vmatprep.mubr.msk.bf16.mxu0 %vm420_vm0, %v1263_v26 }
  0x44   : > { %1184 = vmatprep.mubr.msk.bf16.mxu1 %vm420_vm0, %v1264_v27 }
  0x4a   : > { %1153 = vmatmul.mubr.msk.bf16.gmra.mrb[24].mxu0 %vm420_vm0, %v1265_v28 }
  0x4b   : > { %1185 = vmatmul.mubr.msk.bf16.gmra.mrb[24].mxu1 %vm420_vm0, %v1266_v29  ;;  %1156 = vmatprep.mubr.msk.bf16.mxu0 %vm420_vm0, %v1267_v30 }
  0x4c   : > { %1188 = vmatprep.mubr.msk.bf16.mxu1 %vm420_vm0, %v1268_v31 }
  0x52   : > { %1157 = vmatmul.mubr.msk.bf16.gmra.mrb[28].mxu0 %vm420_vm0, %v1269_v32 }
  0x53   : > { %1189 = vmatmul.mubr.msk.bf16.gmra.mrb[28].mxu1 %vm420_vm0, %v1270_v33 }
  0xed   : > { %v1130_v35 = vpop.f32.mrb[0].mxu0 }
  0xee   : > { %v560_v36 = vadd.f32 %v1130_v35, %v1613_v34  ;;  %v1162_v37 = vpop.f32.mrb[0].mxu1  ;;  %v551_v38 = vpop.f32.mrb[1].mxu0 }
  0xef   : > { %v688_v39 = vadd.f32 %v1162_v37, %v1613_v34  ;;  %v552_v40 = vadd.f32 %v1613_v34, %v551_v38  ;;  %v679_v41 = vpop.f32.mrb[1].mxu1  ;;  %v1131_v42 = vpop.f32.mrb[2].mxu0 }
  0xf0   : > { %1271 = vtanh.f32 %v560_v36  ;;  %v680_v43 = vadd.f32 %v1613_v34, %v679_v41  ;;  %v563_v44 = vadd.f32 %v1131_v42, %v1613_v34  ;;  %v1163_v45 = vpop.f32.mrb[2].mxu1  ;;  %v554_v46 = vpop.f32.mrb[3].mxu0 }
  0xf1   : > { %1273 = vtanh.f32 %v688_v39  ;;  %v691_v47 = vadd.f32 %v1163_v45, %v1613_v34  ;;  %v682_v48 = vpop.f32.mrb[3].mxu1  ;;  %v555_v49 = vadd.f32 %v1613_v34, %v554_v46 }
  0xf2   : > { %1275 = vtanh.f32 %v552_v40  ;;  %v683_v50 = vadd.f32 %v1613_v34, %v682_v48 }
  0xf3   : > { %1277 = vtanh.f32 %v680_v43 }
  0xf4   : > { %1279 = vtanh.f32 %v563_v44 }
  0xf5   : > { %1281 = vtanh.f32 %v691_v47  ;;  %v1134_v51 = vpop.f32.mrb[4].mxu0 }
  0xf6   : > { %1283 = vtanh.f32 %v555_v49  ;;  %v576_v52 = vadd.f32 %v1134_v51, %v1613_v34  ;;  %v1166_v53 = vpop.f32.mrb[4].mxu1  ;;  %v567_v54 = vpop.f32.mrb[5].mxu0 }
  0xf7   : > { %1285 = vtanh.f32 %v683_v50  ;;  %v704_v55 = vadd.f32 %v1166_v53, %v1613_v34  ;;  %v568_v56 = vadd.f32 %v1613_v34, %v567_v54  ;;  %v695_v57 = vpop.f32.mrb[5].mxu1  ;;  %v1135_v58 = vpop.f32.mrb[6].mxu0 }
  0xf8   : > { %1287 = vtanh.f32 %v576_v52  ;;  %v696_v59 = vadd.f32 %v1613_v34, %v695_v57  ;;  %v579_v60 = vadd.f32 %v1135_v58, %v1613_v34  ;;  %v1167_v61 = vpop.f32.mrb[6].mxu1  ;;  %v570_v62 = vpop.f32.mrb[7].mxu0 }
  0xf9   : > { %1289 = vtanh.f32 %v704_v55  ;;  %v707_v63 = vadd.f32 %v1167_v61, %v1613_v34  ;;  %v698_v0 = vpop.f32.mrb[7].mxu1  ;;  %v571_v2 = vadd.f32 %v1613_v34, %v570_v62 }
  0xfa   : > { %v1272_v1 = vpop.eup %1271  ;;  %1291 = vtanh.f32 %v568_v56  ;;  %v699_v4 = vadd.f32 %v1613_v34, %v698_v0 }
  0xfb   : > { %v1274_v3 = vpop.eup %1273  ;;  %872 = vst [vmem:[%s1633_s10 + $0x10] sm:$0xff] %v1272_v1  ;;  %1293 = vtanh.f32 %v696_v59 }
  0xfc   : > { %v1276_v5 = vpop.eup %1275  ;;  %904 = vst [vmem:[%s1633_s10 + $0x110] sm:$0xff] %v1274_v3  ;;  %1295 = vtanh.f32 %v579_v60 }
  0xfd   : > { %v1278_v6 = vpop.eup %1277  ;;  %870 = vst [vmem:[%s1633_s10] sm:$0xff] %v1276_v5  ;;  %1297 = vtanh.f32 %v707_v63  ;;  %v1138_v7 = vpop.f32.mrb[8].mxu0 }
  0xfe   : > { %v1280_v8 = vpop.eup %1279  ;;  %902 = vst [vmem:[%s1633_s10 + $0x100] sm:$0xff] %v1278_v6  ;;  %1299 = vtanh.f32 %v571_v2  ;;  %v592_v9 = vadd.f32 %v1138_v7, %v1613_v34  ;;  %v1170_v10 = vpop.f32.mrb[8].mxu1 }
  0xff   : > { %v583_v11 = vpop.f32.mrb[9].mxu0  ;;  %v1282_v12 = vpop.eup %1281  ;;  %873 = vst [vmem:[%s1633_s10 + $0x18] sm:$0xff] %v1280_v8  ;;  %1301 = vtanh.f32 %v699_v4  ;;  %v720_v13 = vadd.f32 %v1170_v10, %v1613_v34 }
 0x100   : > { %v584_v14 = vadd.f32 %v1613_v34, %v583_v11  ;;  %v711_v15 = vpop.f32.mrb[9].mxu1  ;;  %v1139_v16 = vpop.f32.mrb[10].mxu0  ;;  %905 = vst [vmem:[%s1633_s10 + $0x118] sm:$0xff] %v1282_v12  ;;  %1303 = vtanh.f32 %v592_v9 }
 0x101   : > { %v1284_v17 = vpop.eup %1283  ;;  %v712_v18 = vadd.f32 %v1613_v34, %v711_v15  ;;  %v595_v19 = vadd.f32 %v1139_v16, %v1613_v34  ;;  %v1171_v20 = vpop.f32.mrb[10].mxu1  ;;  %1305 = vtanh.f32 %v720_v13 }
 0x102   : > { %v586_v21 = vpop.f32.mrb[11].mxu0  ;;  %v1286_v22 = vpop.eup %1285  ;;  %871 = vst [vmem:[%s1633_s10 + $0x8] sm:$0xff] %v1284_v17  ;;  %v723_v23 = vadd.f32 %v1171_v20, %v1613_v34  ;;  %1307 = vtanh.f32 %v584_v14 }
 0x103   : > { %v714_v24 = vpop.f32.mrb[11].mxu1  ;;  %v1288_v25 = vpop.eup %1287  ;;  %903 = vst [vmem:[%s1633_s10 + $0x108] sm:$0xff] %v1286_v22  ;;  %v587_v26 = vadd.f32 %v1613_v34, %v586_v21  ;;  %1309 = vtanh.f32 %v712_v18 }
 0x104   : > { %v1290_v27 = vpop.eup %1289  ;;  %876 = vst [vmem:[%s1633_s10 + $0x30] sm:$0xff] %v1288_v25  ;;  %v715_v28 = vadd.f32 %v1613_v34, %v714_v24  ;;  %1311 = vtanh.f32 %v595_v19 }
 0x105   : > { %v1292_v29 = vpop.eup %1291  ;;  %908 = vst [vmem:[%s1633_s10 + $0x130] sm:$0xff] %v1290_v27  ;;  %1313 = vtanh.f32 %v723_v23  ;;  %v1142_v31 = vpop.f32.mrb[12].mxu0 }
 0x106   : > { %v1294_v30 = vpop.eup %1293  ;;  %874 = vst [vmem:[%s1633_s10 + $0x20] sm:$0xff] %v1292_v29  ;;  %1315 = vtanh.f32 %v587_v26  ;;  %v608_v33 = vadd.f32 %v1142_v31, %v1613_v34  ;;  %v1174_v35 = vpop.f32.mrb[12].mxu1 }
 0x107   : > { %v1296_v32 = vpop.eup %1295  ;;  %906 = vst [vmem:[%s1633_s10 + $0x120] sm:$0xff] %v1294_v30  ;;  %v599_v36 = vpop.f32.mrb[13].mxu0  ;;  %1317 = vtanh.f32 %v715_v28  ;;  %v736_v38 = vadd.f32 %v1174_v35, %v1613_v34 }
 0x108   : > { %v1298_v37 = vpop.eup %1297  ;;  %877 = vst [vmem:[%s1633_s10 + $0x38] sm:$0xff] %v1296_v32  ;;  %v600_v39 = vadd.f32 %v1613_v34, %v599_v36  ;;  %v727_v40 = vpop.f32.mrb[13].mxu1  ;;  %1319 = vtanh.f32 %v608_v33 }
 0x109   : > { %v1143_v41 = vpop.f32.mrb[14].mxu0  ;;  %v1300_v42 = vpop.eup %1299  ;;  %909 = vst [vmem:[%s1633_s10 + $0x138] sm:$0xff] %v1298_v37  ;;  %v728_v43 = vadd.f32 %v1613_v34, %v727_v40  ;;  %1321 = vtanh.f32 %v736_v38 }
 0x10a   : > { %v611_v44 = vadd.f32 %v1143_v41, %v1613_v34  ;;  %v1175_v45 = vpop.f32.mrb[14].mxu1  ;;  %v602_v46 = vpop.f32.mrb[15].mxu0  ;;  %875 = vst [vmem:[%s1633_s10 + $0x28] sm:$0xff] %v1300_v42  ;;  %1323 = vtanh.f32 %v600_v39 }
 0x10b   : > { %v1302_v47 = vpop.eup %1301  ;;  %v739_v48 = vadd.f32 %v1175_v45, %v1613_v34  ;;  %v730_v49 = vpop.f32.mrb[15].mxu1  ;;  %v603_v51 = vadd.f32 %v1613_v34, %v602_v46  ;;  %1325 = vtanh.f32 %v728_v43 }
 0x10c   : > { %v1304_v50 = vpop.eup %1303  ;;  %907 = vst [vmem:[%s1633_s10 + $0x128] sm:$0xff] %v1302_v47  ;;  %v731_v53 = vadd.f32 %v1613_v34, %v730_v49  ;;  %1327 = vtanh.f32 %v611_v44 }
 0x10d   : > { %v1306_v52 = vpop.eup %1305  ;;  %880 = vst [vmem:[%s1633_s10 + $0x50] sm:$0xff] %v1304_v50  ;;  %1329 = vtanh.f32 %v739_v48  ;;  %v1146_v56 = vpop.f32.mrb[16].mxu0 }
 0x10e   : > { %v1308_v54 = vpop.eup %1307  ;;  %912 = vst [vmem:[%s1633_s10 + $0x150] sm:$0xff] %v1306_v52  ;;  %1331 = vtanh.f32 %v603_v51  ;;  %v624_v58 = vadd.f32 %v1146_v56, %v1613_v34  ;;  %v1178_v59 = vpop.f32.mrb[16].mxu1 }
 0x10f   : > { %v1310_v55 = vpop.eup %1309  ;;  %878 = vst [vmem:[%s1633_s10 + $0x40] sm:$0xff] %v1308_v54  ;;  %v615_v60 = vpop.f32.mrb[17].mxu0  ;;  %1333 = vtanh.f32 %v731_v53  ;;  %v752_v62 = vadd.f32 %v1178_v59, %v1613_v34 }
 0x110   : > { %v1312_v57 = vpop.eup %1311  ;;  %910 = vst [vmem:[%s1633_s10 + $0x140] sm:$0xff] %v1310_v55  ;;  %v616_v63 = vadd.f32 %v1613_v34, %v615_v60  ;;  %v743_v0 = vpop.f32.mrb[17].mxu1  ;;  %1335 = vtanh.f32 %v624_v58 }
 0x111   : > { %v1314_v61 = vpop.eup %1313  ;;  %881 = vst [vmem:[%s1633_s10 + $0x58] sm:$0xff] %v1312_v57  ;;  %v1147_v1 = vpop.f32.mrb[18].mxu0  ;;  %v744_v3 = vadd.f32 %v1613_v34, %v743_v0  ;;  %1337 = vtanh.f32 %v752_v62 }
 0x112   : > { %v1316_v2 = vpop.eup %1315  ;;  %913 = vst [vmem:[%s1633_s10 + $0x158] sm:$0xff] %v1314_v61  ;;  %v627_v4 = vadd.f32 %v1147_v1, %v1613_v34  ;;  %v1179_v5 = vpop.f32.mrb[18].mxu1  ;;  %1339 = vtanh.f32 %v616_v63 }
 0x113   : > { %v618_v6 = vpop.f32.mrb[19].mxu0  ;;  %v1318_v7 = vpop.eup %1317  ;;  %879 = vst [vmem:[%s1633_s10 + $0x48] sm:$0xff] %v1316_v2  ;;  %v755_v8 = vadd.f32 %v1179_v5, %v1613_v34  ;;  %1341 = vtanh.f32 %v744_v3 }
 0x114   : > { %v746_v9 = vpop.f32.mrb[19].mxu1  ;;  %v1320_v10 = vpop.eup %1319  ;;  %911 = vst [vmem:[%s1633_s10 + $0x148] sm:$0xff] %v1318_v7  ;;  %v619_v11 = vadd.f32 %v1613_v34, %v618_v6  ;;  %1343 = vtanh.f32 %v627_v4 }
 0x115   : > { %v1322_v12 = vpop.eup %1321  ;;  %884 = vst [vmem:[%s1633_s10 + $0x70] sm:$0xff] %v1320_v10  ;;  %v747_v13 = vadd.f32 %v1613_v34, %v746_v9  ;;  %1345 = vtanh.f32 %v755_v8  ;;  %v1150_v16 = vpop.f32.mrb[20].mxu0 }
 0x116   : > { %v1324_v14 = vpop.eup %1323  ;;  %916 = vst [vmem:[%s1633_s10 + $0x170] sm:$0xff] %v1322_v12  ;;  %1347 = vtanh.f32 %v619_v11  ;;  %v640_v18 = vadd.f32 %v1150_v16, %v1613_v34  ;;  %v1182_v19 = vpop.f32.mrb[20].mxu1 }
 0x117   : > { %v1326_v15 = vpop.eup %1325  ;;  %882 = vst [vmem:[%s1633_s10 + $0x60] sm:$0xff] %v1324_v14  ;;  %v631_v20 = vpop.f32.mrb[21].mxu0  ;;  %1349 = vtanh.f32 %v747_v13  ;;  %v768_v22 = vadd.f32 %v1182_v19, %v1613_v34 }
 0x118   : > { %v1328_v17 = vpop.eup %1327  ;;  %914 = vst [vmem:[%s1633_s10 + $0x160] sm:$0xff] %v1326_v15  ;;  %v632_v23 = vadd.f32 %v1613_v34, %v631_v20  ;;  %v759_v24 = vpop.f32.mrb[21].mxu1  ;;  %1351 = vtanh.f32 %v640_v18 }
 0x119   : > { %v1330_v21 = vpop.eup %1329  ;;  %885 = vst [vmem:[%s1633_s10 + $0x78] sm:$0xff] %v1328_v17  ;;  %v1151_v25 = vpop.f32.mrb[22].mxu0  ;;  %v760_v27 = vadd.f32 %v1613_v34, %v759_v24  ;;  %1353 = vtanh.f32 %v768_v22 }
 0x11a   : > { %v1332_v26 = vpop.eup %1331  ;;  %917 = vst [vmem:[%s1633_s10 + $0x178] sm:$0xff] %v1330_v21  ;;  %v643_v28 = vadd.f32 %v1151_v25, %v1613_v34  ;;  %v1183_v29 = vpop.f32.mrb[22].mxu1  ;;  %1355 = vtanh.f32 %v632_v23 }
 0x11b   : > { %v634_v30 = vpop.f32.mrb[23].mxu0  ;;  %v1334_v31 = vpop.eup %1333  ;;  %883 = vst [vmem:[%s1633_s10 + $0x68] sm:$0xff] %v1332_v26  ;;  %v771_v32 = vadd.f32 %v1183_v29, %v1613_v34  ;;  %1357 = vtanh.f32 %v760_v27 }
 0x11c   : > { %v762_v33 = vpop.f32.mrb[23].mxu1  ;;  %v1336_v35 = vpop.eup %1335  ;;  %915 = vst [vmem:[%s1633_s10 + $0x168] sm:$0xff] %v1334_v31  ;;  %v635_v36 = vadd.f32 %v1613_v34, %v634_v30  ;;  %1359 = vtanh.f32 %v643_v28 }
 0x11d   : > { %v1338_v37 = vpop.eup %1337  ;;  %888 = vst [vmem:[%s1633_s10 + $0x90] sm:$0xff] %v1336_v35  ;;  %v763_v38 = vadd.f32 %v1613_v34, %v762_v33  ;;  %1361 = vtanh.f32 %v771_v32  ;;  %v1154_v41 = vpop.f32.mrb[24].mxu0 }
 0x11e   : > { %v1340_v39 = vpop.eup %1339  ;;  %920 = vst [vmem:[%s1633_s10 + $0x190] sm:$0xff] %v1338_v37  ;;  %1363 = vtanh.f32 %v635_v36  ;;  %v656_v43 = vadd.f32 %v1154_v41, %v1613_v34  ;;  %v1186_v44 = vpop.f32.mrb[24].mxu1 }
 0x11f   : > { %v1342_v40 = vpop.eup %1341  ;;  %886 = vst [vmem:[%s1633_s10 + $0x80] sm:$0xff] %v1340_v39  ;;  %v647_v45 = vpop.f32.mrb[25].mxu0  ;;  %1365 = vtanh.f32 %v763_v38  ;;  %v784_v47 = vadd.f32 %v1186_v44, %v1613_v34 }
 0x120   : > { %v1344_v42 = vpop.eup %1343  ;;  %918 = vst [vmem:[%s1633_s10 + $0x180] sm:$0xff] %v1342_v40  ;;  %v648_v48 = vadd.f32 %v1613_v34, %v647_v45  ;;  %v775_v49 = vpop.f32.mrb[25].mxu1  ;;  %1367 = vtanh.f32 %v656_v43 }
 0x121   : > { %v1346_v46 = vpop.eup %1345  ;;  %889 = vst [vmem:[%s1633_s10 + $0x98] sm:$0xff] %v1344_v42  ;;  %v1155_v50 = vpop.f32.mrb[26].mxu0  ;;  %v776_v52 = vadd.f32 %v1613_v34, %v775_v49  ;;  %1369 = vtanh.f32 %v784_v47 }
 0x122   : > { %v1348_v51 = vpop.eup %1347  ;;  %921 = vst [vmem:[%s1633_s10 + $0x198] sm:$0xff] %v1346_v46  ;;  %v659_v53 = vadd.f32 %v1155_v50, %v1613_v34  ;;  %v1187_v54 = vpop.f32.mrb[26].mxu1  ;;  %1371 = vtanh.f32 %v648_v48 }
 0x123   : > { %v650_v55 = vpop.f32.mrb[27].mxu0  ;;  %v1350_v56 = vpop.eup %1349  ;;  %887 = vst [vmem:[%s1633_s10 + $0x88] sm:$0xff] %v1348_v51  ;;  %v787_v57 = vadd.f32 %v1187_v54, %v1613_v34  ;;  %1373 = vtanh.f32 %v776_v52 }
 0x124   : > { %v778_v58 = vpop.f32.mrb[27].mxu1  ;;  %v1352_v59 = vpop.eup %1351  ;;  %919 = vst [vmem:[%s1633_s10 + $0x188] sm:$0xff] %v1350_v56  ;;  %v651_v60 = vadd.f32 %v1613_v34, %v650_v55  ;;  %1375 = vtanh.f32 %v659_v53 }
 0x125   : > { %v1354_v61 = vpop.eup %1353  ;;  %892 = vst [vmem:[%s1633_s10 + $0xb0] sm:$0xff] %v1352_v59  ;;  %v779_v62 = vadd.f32 %v1613_v34, %v778_v58  ;;  %1377 = vtanh.f32 %v787_v57  ;;  %v1158_v1 = vpop.f32.mrb[28].mxu0 }
 0x126   : > { %v1356_v63 = vpop.eup %1355  ;;  %924 = vst [vmem:[%s1633_s10 + $0x1b0] sm:$0xff] %v1354_v61  ;;  %1379 = vtanh.f32 %v651_v60  ;;  %v672_v3 = vadd.f32 %v1158_v1, %v1613_v34  ;;  %v1190_v4 = vpop.f32.mrb[28].mxu1 }
 0x127   : > { %v1358_v0 = vpop.eup %1357  ;;  %890 = vst [vmem:[%s1633_s10 + $0xa0] sm:$0xff] %v1356_v63  ;;  %v663_v5 = vpop.f32.mrb[29].mxu0  ;;  %1381 = vtanh.f32 %v779_v62  ;;  %v800_v7 = vadd.f32 %v1190_v4, %v1613_v34 }
 0x128   : > { %v1360_v2 = vpop.eup %1359  ;;  %922 = vst [vmem:[%s1633_s10 + $0x1a0] sm:$0xff] %v1358_v0  ;;  %v664_v8 = vadd.f32 %v1613_v34, %v663_v5  ;;  %v791_v9 = vpop.f32.mrb[29].mxu1  ;;  %1383 = vtanh.f32 %v672_v3 }
 0x129   : > { %v1362_v6 = vpop.eup %1361  ;;  %893 = vst [vmem:[%s1633_s10 + $0xb8] sm:$0xff] %v1360_v2  ;;  %v1159_v10 = vpop.f32.mrb[30].mxu0  ;;  %v792_v12 = vadd.f32 %v1613_v34, %v791_v9  ;;  %1385 = vtanh.f32 %v800_v7 }
 0x12a   : > { %v1364_v11 = vpop.eup %1363  ;;  %925 = vst [vmem:[%s1633_s10 + $0x1b8] sm:$0xff] %v1362_v6  ;;  %v675_v13 = vadd.f32 %v1159_v10, %v1613_v34  ;;  %v1191_v14 = vpop.f32.mrb[30].mxu1  ;;  %1387 = vtanh.f32 %v664_v8 }
 0x12b   : > { %v666_v15 = vpop.f32.mrb[31].mxu0  ;;  %v1366_v16 = vpop.eup %1365  ;;  %891 = vst [vmem:[%s1633_s10 + $0xa8] sm:$0xff] %v1364_v11  ;;  %v803_v17 = vadd.f32 %v1191_v14, %v1613_v34  ;;  %1389 = vtanh.f32 %v792_v12 }
 0x12c   : > { %v794_v18 = vpop.f32.mrb[31].mxu1  ;;  %v1368_v19 = vpop.eup %1367  ;;  %923 = vst [vmem:[%s1633_s10 + $0x1a8] sm:$0xff] %v1366_v16  ;;  %v667_v20 = vadd.f32 %v1613_v34, %v666_v15  ;;  %1391 = vtanh.f32 %v675_v13 }
 0x12d   : > { %v1370_v21 = vpop.eup %1369  ;;  %896 = vst [vmem:[%s1633_s10 + $0xd0] sm:$0xff] %v1368_v19  ;;  %v795_v22 = vadd.f32 %v1613_v34, %v794_v18  ;;  %1393 = vtanh.f32 %v803_v17 }
 0x12e   : > { %v1372_v23 = vpop.eup %1371  ;;  %928 = vst [vmem:[%s1633_s10 + $0x1d0] sm:$0xff] %v1370_v21  ;;  %1395 = vtanh.f32 %v667_v20 }
 0x12f   : > { %v1374_v24 = vpop.eup %1373  ;;  %894 = vst [vmem:[%s1633_s10 + $0xc0] sm:$0xff] %v1372_v23  ;;  %1397 = vtanh.f32 %v795_v22 }
 0x130   : > { %v1376_v25 = vpop.eup %1375  ;;  %926 = vst [vmem:[%s1633_s10 + $0x1c0] sm:$0xff] %v1374_v24 }
 0x131   : > { %v1378_v26 = vpop.eup %1377  ;;  %897 = vst [vmem:[%s1633_s10 + $0xd8] sm:$0xff] %v1376_v25 }
 0x132   : > { %v1380_v34 = vpop.eup %1379  ;;  %929 = vst [vmem:[%s1633_s10 + $0x1d8] sm:$0xff] %v1378_v26 }
 0x133   : > { %v1382_v27 = vpop.eup %1381  ;;  %895 = vst [vmem:[%s1633_s10 + $0xc8] sm:$0xff] %v1380_v34 }
 0x134   : > { %v1384_v28 = vpop.eup %1383  ;;  %927 = vst [vmem:[%s1633_s10 + $0x1c8] sm:$0xff] %v1382_v27 }
 0x135   : > { %v1386_v29 = vpop.eup %1385  ;;  %900 = vst [vmem:[%s1633_s10 + $0xf0] sm:$0xff] %v1384_v28 }
 0x136   : > { %v1388_v30 = vpop.eup %1387  ;;  %932 = vst [vmem:[%s1633_s10 + $0x1f0] sm:$0xff] %v1386_v29 }
 0x137   : > { %v1390_v31 = vpop.eup %1389  ;;  %898 = vst [vmem:[%s1633_s10 + $0xe0] sm:$0xff] %v1388_v30 }
 0x138   : > { %v1392_v32 = vpop.eup %1391  ;;  %930 = vst [vmem:[%s1633_s10 + $0x1e0] sm:$0xff] %v1390_v31 }
 0x139   : > { %v1394_v33 = vpop.eup %1393  ;;  %901 = vst [vmem:[%s1633_s10 + $0xf8] sm:$0xff] %v1392_v32 }
 0x13a   : > { %v1396_v35 = vpop.eup %1395  ;;  %933 = vst [vmem:[%s1633_s10 + $0x1f8] sm:$0xff] %v1394_v33 }
 0x13b   : > { %v1398_v36 = vpop.eup %1397  ;;  %899 = vst [vmem:[%s1633_s10 + $0xe8] sm:$0xff] %v1396_v35 }
 0x13c   : > { %931 = vst [vmem:[%s1633_s10 + $0x1e8] sm:$0xff] %v1398_v36 }
 0x13d   : > { %1412 = shalt.err (!%p1409_p3)
}
 0x13e   : > { %s1413_s29 = scalar_lea.hbm %s1750_s24, 8192  ;;  %s1417_s5 = scalar_lea.hbm %s1803_s3, 32768 }
 0x13f   : > { %p1414_p4 = scmp.ne.s32.totalorder %s1750_s24, %s1413_s29  ;;  %p1418_p9 = scmp.lt.u32.totalorder %s1750_s24, %s1803_s3 }
 0x140   : > { %p1419_p10 = scmp.lt.u32.totalorder %s1417_s5, %s1413_s29  ;;  %p1421_p12 = scmp.lt.u32.totalorder %s1413_s29, %s1750_s24 }
 0x141   : > { %p1415_p7 = pnand %p1414_p4, %p1524_p5 }
 0x142   : > { %p1420_p11 = por %p1419_p10, %p1418_p9 }
 0x143   : > { %p1416_p8 = pneg %p1415_p7 }
 0x144   : > { %p1422_p13 = por %p1421_p12, %p1420_p11 }
 0x146   : > { %p1423_p0 = pnand %p1422_p13, %p1416_p8 }
 0x148   : > { %1426 = shalt.err (!%p1423_p0)
}
 0x149   : > { %s1464_s8 = smov 128   ;;  %s1465_s9 = smov 8  }
 0x14a   : > { %1196 = dma.vmem_to_hbm [thread:$0]  (%p1524_p5), %s1752_s17, 8192, %s1750_s24, %s1759_s16, %s1464_s8, %s1464_s8, %s1465_s9  }
 0x14b PF: > { %p1202_p1 = scmp.ge.s32.totalorder %s1461_s15, 2  ;;  %s963_s10 = sand.u32 1, %s1449_s12  }
 0x14c   : > { %s964_s11 = scalar_lea.sflag [#allocation3], %s963_s10 }
 0x14d   : > { %p1199_p2 = pnand %p1202_p1, %p1528_p6 }
 0x14f   : > { %1444 = dma.done.wait (!%p1199_p2), %s964_s11, 8192  }
 0x150   : > { %1446 = vsyncadd (!%p1199_p2), %s964_s11, 4294959104  ;;  %p13_p3 = scmp.ge.s32.totalorder %s1511_s18, 6   ;;  %s1806_s12 = smov %s1453_s13 }
 0x151   : > { %s1807_s13 = smov %s1457_s14  ;;  %s1808_s14 = smov %s1522_s21 }
 0x152   : > { %s1809_s15 = smov %s1511_s18  ;;  %15 = sbr.rel (!%p13_p3) target bundleno = 3 (0x3), region = 67 }
 0x159   :  { %969 = vsyncpa [#allocation3], 1 }
 0x15a   :  { %971 = vsyncpa [#allocation3 + $0x1], 1 }

</bundles_post_ra>
